<compile_context>
chip_gen: v7x
topology: tpu7x:2x2x1
jax: 0.10.0
libtpu: 0.0.40
codegen_flags: <defaults>
</compile_context>

<pallas_src>
import jax
import jax.numpy as jnp
from jax.experimental import pallas as pl
from jax.experimental.pallas import tpu as pltpu

IN_F = 16 * 4 * 4          # 256
H1, H2, OUT = 120, 84, 10
PAD = 128                  # lane-padded hidden / output width
TM_TARGET = 1024           # batch tile cap for large B


def _round_up(n, m):
    return ((n + m - 1) // m) * m


def _choose_tiling(B):
    """Pick (tm, bp): tm multiple of 8, bp = padded batch = multiple of tm.
    Prefer >=2 grid steps when the batch allows it (v7x dual-TC sharding)."""
    b8 = _round_up(max(B, 8), 8)
    if b8 <= 8:
        return b8, b8
    if b8 <= 2 * TM_TARGET:
        tm = _round_up(b8 // 2, 8)          # two roughly equal tiles
    else:
        tm = TM_TARGET
    bp = _round_up(B, tm)
    return tm, bp


def _mlp_kernel(x_ref, w1_ref, b1_ref, w2_ref, b2_ref, w3_ref, b3_ref, o_ref):
    # x arrives as f32; cast to bf16 here (free filler under the DMA bound).
    x = x_ref[...].astype(jnp.bfloat16)
    # fc1 + relu (bf16 operands, f32 accumulation)
    h1 = jnp.dot(x, w1_ref[...], preferred_element_type=jnp.float32)
    h1 = jnp.maximum(h1 + b1_ref[...], 0.0)
    # fc2 + relu
    h2 = jnp.dot(h1.astype(jnp.bfloat16), w2_ref[...],
                 preferred_element_type=jnp.float32)
    h2 = jnp.maximum(h2 + b2_ref[...], 0.0)
    # fc3 (no activation); store bf16 lane-dense tile
    h3 = jnp.dot(h2.astype(jnp.bfloat16), w3_ref[...],
                 preferred_element_type=jnp.float32)
    o_ref[...] = (h3 + b3_ref[...]).astype(o_ref.dtype)


def _pad2(a, rows, cols):
    r, c = a.shape
    return jnp.pad(a, ((0, rows - r), (0, cols - c)))


def prepare_params(params):
    """One-time: pad features to 128 lanes, cast weights to bf16, biases to f32 rows."""
    return {
        "w1": _pad2(params["w1"], IN_F, PAD).astype(jnp.bfloat16),
        "w2": _pad2(params["w2"], PAD, PAD).astype(jnp.bfloat16),
        "w3": _pad2(params["w3"], PAD, PAD).astype(jnp.bfloat16),
        "b1": jnp.pad(params["b1"], (0, PAD - H1)).reshape(1, PAD).astype(jnp.float32),
        "b2": jnp.pad(params["b2"], (0, PAD - H2)).reshape(1, PAD).astype(jnp.float32),
        "b3": jnp.pad(params["b3"], (0, PAD - OUT)).reshape(1, PAD).astype(jnp.float32),
    }


def _f2_forward(x, prep):
    """x: (B, 256) float32. prep: output of prepare_params(). Returns (B, 10) f32."""
    B, fin = x.shape
    assert fin == IN_F, fin
    x = x.astype(jnp.float32)

    tm, bp = _choose_tiling(B)
    grid = (bp // tm,)

    # Only pad the batch when the last block is ragged (padded rows are junk,
    # sliced off below; rows are independent so this is safe).
    x_in = x if bp == B else jnp.pad(x, ((0, bp - B), (0, 0)))

    w1p, w2p, w3p = prep["w1"], prep["w2"], prep["w3"]
    b1p, b2p, b3p = prep["b1"], prep["b2"], prep["b3"]

    resident = lambda a: pl.BlockSpec(a.shape, lambda i: (0, 0))

    # Truthful traffic estimate: f32 x in, bf16 padded logits out, resident params once.
    flops = 2 * bp * (IN_F * PAD + PAD * PAD + PAD * PAD)
    bytes_accessed = (
        bp * IN_F * 4                              # x (f32) in
        + bp * PAD * 2                             # padded logits (bf16) out
        + (w1p.size + w2p.size + w3p.size) * 2     # bf16 weights
        + (b1p.size + b2p.size + b3p.size) * 4     # f32 biases
    )

    out_padded = pl.pallas_call(
        _mlp_kernel,
        out_shape=jax.ShapeDtypeStruct((bp, PAD), jnp.bfloat16),
        grid=grid,
        in_specs=[
            pl.BlockSpec((tm, IN_F), lambda i: (i, 0)),   # x: tiled over batch
            resident(w1p), resident(b1p),
            resident(w2p), resident(b2p),
            resident(w3p), resident(b3p),
        ],
        out_specs=pl.BlockSpec((tm, PAD), lambda i: (i, 0)),
        compiler_params=pltpu.CompilerParams(
            dimension_semantics=("parallel",),
            vmem_limit_bytes=32 << 20,
        ),
        cost_estimate=pl.CostEstimate(
            flops=flops, transcendentals=0, bytes_accessed=bytes_accessed
        ),
    )(x_in, w1p, b1p, w2p, b2p, w3p, b3p)

    # Strip batch/lane padding and upcast logits to f32 outside the kernel.
    return out_padded[:B, :OUT].astype(jnp.float32)


f2_forward = jax.jit(_f2_forward)


def init_params(key):
    """Deterministic init matching PyTorch Linear shapes (stored transposed: (in, out))."""
    dims = [(IN_F, H1), (H1, H2), (H2, OUT)]
    params = {}
    for i, (fan_in, fan_out) in enumerate(dims, start=1):
        key, kw, kb = jax.random.split(key, 3)
        bound = 1.0 / jnp.sqrt(fan_in)
        params[f"w{i}"] = jax.random.uniform(
            kw, (fan_in, fan_out), jnp.float32, -bound, bound
        )
        params[f"b{i}"] = jax.random.uniform(
            kb, (fan_out,), jnp.float32, -bound, bound
        )
    return params


def f2_reference(x, params):
    h = jnp.maximum(x @ params["w1"] + params["b1"], 0.0)
    h = jnp.maximum(h @ params["w2"] + params["b2"], 0.0)
    return h @ params["w3"] + params["b3"]


if __name__ == "__main__":
    key = jax.random.PRNGKey(0)
    key, kx = jax.random.split(key)
    B = 2
    x = jax.random.normal(kx, (B, IN_F), jnp.float32)
    params = init_params(key)
    prep = prepare_params(params)          # one-time param prep (hoisted out of forward)

    out = f2_forward(x, prep)
    out = jax.block_until_ready(out)

    ref = f2_reference(x, params)
    assert out.shape == (B, OUT), out.shape
    # bf16 inputs/weights/output with f32 accumulation -> looser tolerance than pure f32.
    assert jnp.allclose(out, ref, atol=3e-2, rtol=3e-2), "mismatch vs reference"
    print("KERNEL_OK")
</pallas_src>

<mosaic_0001>
module attributes {stable_mosaic.version = 11 : i64} {
  func.func @_mlp_kernel(%arg0: i32, %arg1: memref<8x256xf32, #tpu.memory_space<vmem>>, %arg2: memref<256x128xbf16, #tpu.memory_space<vmem>>, %arg3: memref<1x128xf32, #tpu.memory_space<vmem>>, %arg4: memref<128x128xbf16, #tpu.memory_space<vmem>>, %arg5: memref<1x128xf32, #tpu.memory_space<vmem>>, %arg6: memref<128x128xbf16, #tpu.memory_space<vmem>>, %arg7: memref<1x128xf32, #tpu.memory_space<vmem>>, %arg8: memref<8x128xbf16, #tpu.memory_space<vmem>>) attributes {dimension_semantics = [#tpu.dimension_semantics<parallel>], iteration_bounds = array<i64: 1>, scalar_prefetch = 0 : i64, scratch_operands = 0 : i64, tpu.core_type = #tpu.core_type<tc>, window_params = [{transform_indices = @transform_0, window_bounds = array<i64: 8, 256>}, {pipeline_mode = #tpu.pipeline_mode<synchronous>, transform_indices = @transform_1, window_bounds = array<i64: 256, 128>}, {pipeline_mode = #tpu.pipeline_mode<synchronous>, transform_indices = @transform_2, window_bounds = array<i64: 1, 128>}, {pipeline_mode = #tpu.pipeline_mode<synchronous>, transform_indices = @transform_3, window_bounds = array<i64: 128, 128>}, {pipeline_mode = #tpu.pipeline_mode<synchronous>, transform_indices = @transform_4, window_bounds = array<i64: 1, 128>}, {pipeline_mode = #tpu.pipeline_mode<synchronous>, transform_indices = @transform_5, window_bounds = array<i64: 128, 128>}, {pipeline_mode = #tpu.pipeline_mode<synchronous>, transform_indices = @transform_6, window_bounds = array<i64: 1, 128>}, {transform_indices = @transform_7, window_bounds = array<i64: 8, 128>}]} {
    %c0 = arith.constant 0 : index
    %c0_0 = arith.constant 0 : index
    %0 = vector.load %arg1[%c0, %c0_0] : memref<8x256xf32, #tpu.memory_space<vmem>>, vector<8x256xf32>
    %1 = arith.truncf %0 : vector<8x256xf32> to vector<8x256xbf16>
    %c0_1 = arith.constant 0 : index
    %c0_2 = arith.constant 0 : index
    %2 = vector.load %arg2[%c0_1, %c0_2] : memref<256x128xbf16, #tpu.memory_space<vmem>>, vector<256x128xbf16>
    %cst = arith.constant dense<0.000000e+00> : vector<8x128xf32>
    %3 = tpu.matmul %1, %2, %cst {dimension_numbers = #tpu.dot_dimension_numbers<[1], [0], [0], [1], [0, 0, 1, 1], [], []>} : vector<8x256xbf16>, vector<256x128xbf16>, vector<8x128xf32> -> vector<8x128xf32>
    %c0_3 = arith.constant 0 : index
    %c0_4 = arith.constant 0 : index
    %4 = vector.load %arg3[%c0_3, %c0_4] : memref<1x128xf32, #tpu.memory_space<vmem>>, vector<1x128xf32>
    %5 = vector.broadcast %4 : vector<1x128xf32> to vector<8x128xf32>
    %6 = arith.addf %3, %5 : vector<8x128xf32>
    %cst_5 = arith.constant 0.000000e+00 : f32
    %7 = vector.broadcast %cst_5 : f32 to vector<8x128xf32>
    %8 = arith.maximumf %6, %7 : vector<8x128xf32>
    %9 = arith.truncf %8 : vector<8x128xf32> to vector<8x128xbf16>
    %c0_6 = arith.constant 0 : index
    %c0_7 = arith.constant 0 : index
    %10 = vector.load %arg4[%c0_6, %c0_7] : memref<128x128xbf16, #tpu.memory_space<vmem>>, vector<128x128xbf16>
    %cst_8 = arith.constant dense<0.000000e+00> : vector<8x128xf32>
    %11 = tpu.matmul %9, %10, %cst_8 {dimension_numbers = #tpu.dot_dimension_numbers<[1], [0], [0], [1], [0, 0, 1, 1], [], []>} : vector<8x128xbf16>, vector<128x128xbf16>, vector<8x128xf32> -> vector<8x128xf32>
    %c0_9 = arith.constant 0 : index
    %c0_10 = arith.constant 0 : index
    %12 = vector.load %arg5[%c0_9, %c0_10] : memref<1x128xf32, #tpu.memory_space<vmem>>, vector<1x128xf32>
    %13 = vector.broadcast %12 : vector<1x128xf32> to vector<8x128xf32>
    %14 = arith.addf %11, %13 : vector<8x128xf32>
    %cst_11 = arith.constant 0.000000e+00 : f32
    %15 = vector.broadcast %cst_11 : f32 to vector<8x128xf32>
    %16 = arith.maximumf %14, %15 : vector<8x128xf32>
    %17 = arith.truncf %16 : vector<8x128xf32> to vector<8x128xbf16>
    %c0_12 = arith.constant 0 : index
    %c0_13 = arith.constant 0 : index
    %18 = vector.load %arg6[%c0_12, %c0_13] : memref<128x128xbf16, #tpu.memory_space<vmem>>, vector<128x128xbf16>
    %cst_14 = arith.constant dense<0.000000e+00> : vector<8x128xf32>
    %19 = tpu.matmul %17, %18, %cst_14 {dimension_numbers = #tpu.dot_dimension_numbers<[1], [0], [0], [1], [0, 0, 1, 1], [], []>} : vector<8x128xbf16>, vector<128x128xbf16>, vector<8x128xf32> -> vector<8x128xf32>
    %c0_15 = arith.constant 0 : index
    %c0_16 = arith.constant 0 : index
    %20 = vector.load %arg7[%c0_15, %c0_16] : memref<1x128xf32, #tpu.memory_space<vmem>>, vector<1x128xf32>
    %21 = vector.broadcast %20 : vector<1x128xf32> to vector<8x128xf32>
    %22 = arith.addf %19, %21 : vector<8x128xf32>
    %23 = arith.truncf %22 : vector<8x128xf32> to vector<8x128xbf16>
    %c0_17 = arith.constant 0 : index
    %c0_18 = arith.constant 0 : index
    %24 = vector.load %arg8[%c0_17, %c0_18] : memref<8x128xbf16, #tpu.memory_space<vmem>>, vector<8x128xbf16>
    tpu.vector_store %arg8[%c0_17, %c0_18], %23 {strides = array<i32>} : memref<8x128xbf16, #tpu.memory_space<vmem>>, vector<8x128xbf16>,
    return
  }
  func.func @transform_0(%arg0: i32) -> (i32, i32) {
    %c0_i32 = arith.constant 0 : i32
    %c0_i32_0 = arith.constant 0 : i32
    return %arg0, %c0_i32 : i32, i32
  }
  func.func @transform_1(%arg0: i32) -> (i32, i32) {
    %c0_i32 = arith.constant 0 : i32
    %c0_i32_0 = arith.constant 0 : i32
    %c0_i32_1 = arith.constant 0 : i32
    return %c0_i32, %c0_i32_0 : i32, i32
  }
  func.func @transform_2(%arg0: i32) -> (i32, i32) {
    %c0_i32 = arith.constant 0 : i32
    %c0_i32_0 = arith.constant 0 : i32
    %c0_i32_1 = arith.constant 0 : i32
    return %c0_i32, %c0_i32_0 : i32, i32
  }
  func.func @transform_3(%arg0: i32) -> (i32, i32) {
    %c0_i32 = arith.constant 0 : i32
    %c0_i32_0 = arith.constant 0 : i32
    %c0_i32_1 = arith.constant 0 : i32
    return %c0_i32, %c0_i32_0 : i32, i32
  }
  func.func @transform_4(%arg0: i32) -> (i32, i32) {
    %c0_i32 = arith.constant 0 : i32
    %c0_i32_0 = arith.constant 0 : i32
    %c0_i32_1 = arith.constant 0 : i32
    return %c0_i32, %c0_i32_0 : i32, i32
  }
  func.func @transform_5(%arg0: i32) -> (i32, i32) {
    %c0_i32 = arith.constant 0 : i32
    %c0_i32_0 = arith.constant 0 : i32
    %c0_i32_1 = arith.constant 0 : i32
    return %c0_i32, %c0_i32_0 : i32, i32
  }
  func.func @transform_6(%arg0: i32) -> (i32, i32) {
    %c0_i32 = arith.constant 0 : i32
    %c0_i32_0 = arith.constant 0 : i32
    %c0_i32_1 = arith.constant 0 : i32
    return %c0_i32, %c0_i32_0 : i32, i32
  }
  func.func @transform_7(%arg0: i32) -> (i32, i32) {
    %c0_i32 = arith.constant 0 : i32
    %c0_i32_0 = arith.constant 0 : i32
    return %arg0, %c0_i32 : i32, i32
  }
}

</mosaic_0001>

<bundles_post_ra>
// kernel: _f2_forward.1
= control target key start
LH: loop header
LB: loop body
LE: loop exit
PB: predicated region body
PF: predicated region fallthrough
CT: control target
= control target key end

     0   :  { %12 = vsyncpa [#allocation3], 0  ;;  %s840_s0 = inlined_call_operand.vmem [shape: f32[8,256], index: 0, kind: input, shape index: {}]   ;;  %s841_s1 = inlined_call_operand.hbm [shape: bf16[256,128], index: 1, kind: input, shape index: {}]   ;;  %s842_s2 = inlined_call_operand.vmem [shape: f32[1,128], index: 2, kind: input, shape index: {}]   ;;  %s843_s3 = inlined_call_operand.hbm [shape: bf16[128,128], index: 3, kind: input, shape index: {}]   ;;  %s844_s4 = inlined_call_operand.vmem [shape: f32[1,128], index: 4, kind: input, shape index: {}]   ;;  %s845_s5 = inlined_call_operand.hbm [shape: bf16[128,128], index: 5, kind: input, shape index: {}]   ;;  %s846_s6 = inlined_call_operand.vmem [shape: f32[1,128], index: 6, kind: input, shape index: {}]   ;;  %s847_s7 = inlined_call_operand.vmem [shape: bf16[8,128], index: 7, kind: output, shape index: {}]  }
   0x1   :  { %13 = vsyncpa [#allocation5], 0  ;;  %s705_s24 = smov [#allocation4]   ;;  %s706_s26 = smov [#allocation2]  }
   0x2   :  { %s35_s25 = sshll.u32 %s705_s24, 4  ;;  %s21_s27 = sshll.u32 %s706_s26, 4  ;;  %s36_s25 = int_to_ptr.vmem [resolvable:$true] %s35_s25  ;;  %s752_s27 = int_to_ptr.vmem [resolvable:$true] %s21_s27 }
   0x3   :  { %s635_s30 = scalar_lea.hbm %s843_s3, 1024 }
   0x4   :  { %p636_p0 = scmp.ne.s32.totalorder %s843_s3, %s635_s30  ;;  %p639_p1 = scmp.lt.u32.totalorder %s635_s30, %s843_s3 }
   0x6   :  { %p641_p2 = pnand %p639_p1, %p636_p0 }
   0x8   :  { %644 = shalt.err (!%p641_p2)
}
   0x9   :  { %s645_s12 = scalar_lea.vmem %s36_s25, 1024  ;;  %p650_p4 = scmp.lt.s32.totalorder %s36_s25, %s36_s25 }
   0xa   :  { %p646_p3 = scmp.ne.s32.totalorder %s36_s25, %s645_s12  ;;  %p651_p5 = scmp.lt.s32.totalorder %s645_s12, %s645_s12 }
   0xc   :  { %p652_p6 = por %p651_p5, %p650_p4 }
   0xe   :  { %p653_p7 = pnand %p652_p6, %p646_p3 }
  0x10   :  { %656 = shalt.err (!%p653_p7)
}
  0x11   :  { %s707_s13 = smov 64   ;;  %s708_s14 = smov 4  }
  0x12   :  { %41 = dma.hbm_to_vmem [thread:$0]  %s843_s3, 1024, %s36_s25, [#allocation5], %s707_s13, %s707_s13, %s708_s14  }
  0x13   :  { %s657_s19 = scalar_lea.hbm %s841_s1, 2048 }
  0x14   :  { %p658_p8 = scmp.ne.s32.totalorder %s841_s1, %s657_s19  ;;  %p661_p9 = scmp.lt.u32.totalorder %s657_s19, %s841_s1 }
  0x16   :  { %p663_p10 = pnand %p661_p9, %p658_p8 }
  0x18   :  { %666 = shalt.err (!%p663_p10)
}
  0x19   :  { %s667_s24 = scalar_lea.vmem %s752_s27, 2048  ;;  %p672_p12 = scmp.lt.s32.totalorder %s752_s27, %s752_s27 }
  0x1a   :  { %p668_p11 = scmp.ne.s32.totalorder %s752_s27, %s667_s24  ;;  %p673_p13 = scmp.lt.s32.totalorder %s667_s24, %s667_s24 }
  0x1c   :  { %p674_p0 = por %p673_p13, %p672_p12 }
  0x1e   :  { %p675_p1 = pnand %p674_p0, %p668_p11 }
  0x20   :  { %678 = shalt.err (!%p675_p1)
}
  0x21   :  { %27 = dma.hbm_to_vmem [thread:$0]  %s841_s1, 2048, %s752_s27, [#allocation3], %s707_s13, %s707_s13, %s708_s14  }
  0x22   :  { %s709_s26 = smov [#allocation6]   ;;  %s679_s8 = scalar_lea.hbm %s845_s5, 1024 }
  0x23   :  { %s49_s28 = sshll.u32 %s709_s26, 4  ;;  %p680_p2 = scmp.ne.s32.totalorder %s845_s5, %s679_s8  ;;  %s50_s28 = int_to_ptr.vmem [resolvable:$true] %s49_s28 }
  0x24   :  { %p683_p3 = scmp.lt.u32.totalorder %s679_s8, %s845_s5 }
  0x26   :  { %p685_p4 = pnand %p683_p3, %p680_p2 }
  0x28   :  { %688 = shalt.err (!%p685_p4)
}
  0x29   :  { %s689_s15 = scalar_lea.vmem %s50_s28, 1024  ;;  %p694_p6 = scmp.lt.s32.totalorder %s50_s28, %s50_s28 }
  0x2a   :  { %p690_p5 = scmp.ne.s32.totalorder %s50_s28, %s689_s15  ;;  %p695_p7 = scmp.lt.s32.totalorder %s689_s15, %s689_s15 }
  0x2c   :  { %p696_p8 = por %p695_p7, %p694_p6 }
  0x2e   :  { %p697_p9 = pnand %p696_p8, %p690_p5 }
  0x30   :  { %700 = shalt.err (!%p697_p9)
}
  0x31   :  { %55 = dma.hbm_to_vmem [thread:$0]  %s845_s5, 1024, %s50_s28, [#allocation5], %s707_s13, %s707_s13, %s708_s14  }
  0x32   :  { %701 = dma.done.wait [#allocation3], 2048  }
  0x33   :  { %702 = vsyncadd [#allocation3], 4294965248 }
  0x34   :  { %703 = dma.done.wait [#allocation5], 2048  }
  0x35   :  { %704 = vsyncadd [#allocation5], 4294965248  ;;  %v710_v0 = vmov 0.0   ;;  %v603_v1 = vld [vmem:[#allocation2 + $0x40] sm:$0xff]   ;;  %v605_v3 = vld [vmem:[#allocation2 + $0x48] sm:$0xff]   ;;  %vm711_vm0 = vmmov 0  }
  0x36   :  { %556 = vmatprep.subr.bf16.mxu1 %v710_v0  ;;  %v604_v2 = vld [vmem:[#allocation2] sm:$0xff]   ;;  %516 = vmatprep.subr.bf16.mxu0 %v603_v1  ;;  %v606_v4 = vld [vmem:[#allocation2 + $0x8] sm:$0xff]   ;;  %v607_v5 = vld [vmem:[#allocation2 + $0x50] sm:$0xff]  }
  0x37   :  { %517 = vmatpush3.bf16.msra.mxu0 %v604_v2  ;;  %v608_v6 = vld [vmem:[#allocation2 + $0x10] sm:$0xff]   ;;  %v609_v7 = vld [vmem:[#allocation2 + $0x58] sm:$0xff]   ;;  %v611_v9 = vld [vmem:[#allocation2 + $0x60] sm:$0xff]   ;;  %572 = vmatprep.mubr.msk.bf16.mxu1 %vm711_vm0, %v710_v0 }
  0x38   :  { %518 = vmatprep.subr.bf16.mxu0 %v605_v3  ;;  %v610_v8 = vld [vmem:[#allocation2 + $0x18] sm:$0xff]   ;;  %v612_v10 = vld [vmem:[#allocation2 + $0x20] sm:$0xff]   ;;  %v613_v11 = vld [vmem:[#allocation2 + $0x68] sm:$0xff]  }
  0x39   :  { %v69_v12 = vld [vmem:[%s840_s0 + $0x8] sm:$0xff]  ;;  %v619_v14 = vld [vmem:[#allocation4] sm:$0xff]   ;;  %v615_v16 = vld [vmem:[#allocation2 + $0x70] sm:$0xff]  }
  0x3a   :  { %v71_v13 = vpack.c.bf16 %v69_v12, %v69_v12  ;;  %v614_v15 = vld [vmem:[#allocation2 + $0x28] sm:$0xff]   ;;  %557 = vmatpush3.bf16.msra.mxu1 %v619_v14  ;;  %v616_v18 = vld [vmem:[#allocation2 + $0x30] sm:$0xff]   ;;  %v617_v19 = vld [vmem:[#allocation2 + $0x78] sm:$0xff]  }
  0x3b   :  { %519 = vmatpush3.bf16.msra.mxu0 %v606_v4  ;;  %v620_v17 = vld [vmem:[#allocation4 + $0x8] sm:$0xff]   ;;  %558 = vmatprep.subr.bf16.mxu1 %v710_v0  ;;  %v621_v20 = vld [vmem:[#allocation4 + $0x10] sm:$0xff]   ;;  %v618_v21 = vld [vmem:[#allocation2 + $0x38] sm:$0xff]  }
  0x3c   :  { %520 = vmatprep.subr.bf16.mxu0 %v607_v5  ;;  %239 = vmatprep.mubr.bf16.mxu0 %v71_v13  ;;  %v68_v22 = vld [vmem:[%s840_s0] sm:$0xff]  ;;  %v622_v23 = vld [vmem:[#allocation4 + $0x18] sm:$0xff]   ;;  %v624_v26 = vld [vmem:[#allocation4 + $0x28] sm:$0xff]  }
  0x3d   :  { %v70_v24 = vpack.c.bf16 %v68_v22, %v68_v22  ;;  %v623_v25 = vld [vmem:[#allocation4 + $0x20] sm:$0xff]   ;;  %v625_v27 = vld [vmem:[#allocation4 + $0x30] sm:$0xff]   ;;  %v626_v28 = vld [vmem:[#allocation4 + $0x38] sm:$0xff]  }
  0x3e   :  { %559 = vmatpush3.bf16.msra.mxu1 %v620_v17  ;;  %v627_v29 = vld [vmem:[#allocation6] sm:$0xff]   ;;  %v628_v30 = vld [vmem:[#allocation6 + $0x8] sm:$0xff]   ;;  %v629_v31 = vld [vmem:[#allocation6 + $0x10] sm:$0xff]  }
  0x3f   :  { %521 = vmatpush3.bf16.msra.mxu0 %v608_v6  ;;  %560 = vmatprep.subr.bf16.mxu1 %v710_v0  ;;  %v630_v32 = vld [vmem:[#allocation6 + $0x18] sm:$0xff]   ;;  %v631_v33 = vld [vmem:[#allocation6 + $0x20] sm:$0xff]   ;;  %v632_v34 = vld [vmem:[#allocation6 + $0x28] sm:$0xff]  }
  0x40   :  { %522 = vmatprep.subr.bf16.mxu0 %v609_v7  ;;  %v481_v36 = vld [vmem:[%s842_s2] ss:$0 sm:$0xff]  ;;  %v633_v44 = vld [vmem:[#allocation6 + $0x30] sm:$0xff]   ;;  %v634_v45 = vld [vmem:[#allocation6 + $0x38] sm:$0xff]  }
  0x41   :  { %v498_v46 = vld [vmem:[%s844_s4] ss:$0 sm:$0xff] }
  0x42   :  { %561 = vmatpush3.bf16.msra.mxu1 %v621_v20  ;;  %v507_v54 = vld [vmem:[%s846_s6] ss:$0 sm:$0xff] }
  0x43   :  { %523 = vmatpush3.bf16.msra.mxu0 %v610_v8  ;;  %562 = vmatprep.subr.bf16.mxu1 %v710_v0 }
  0x44   :  { %524 = vmatprep.subr.bf16.mxu0 %v611_v9 }
  0x46   :  { %563 = vmatpush3.bf16.msra.mxu1 %v622_v23 }
  0x47   :  { %525 = vmatpush3.bf16.msra.mxu0 %v612_v10  ;;  %564 = vmatprep.subr.bf16.mxu1 %v710_v0 }
  0x48   :  { %526 = vmatprep.subr.bf16.mxu0 %v613_v11 }
  0x4a   :  { %565 = vmatpush3.bf16.msra.mxu1 %v623_v25 }
  0x4b   :  { %527 = vmatpush3.bf16.msra.mxu0 %v614_v15  ;;  %566 = vmatprep.subr.bf16.mxu1 %v710_v0 }
  0x4c   :  { %528 = vmatprep.subr.bf16.mxu0 %v615_v16 }
  0x4e   :  { %567 = vmatpush3.bf16.msra.mxu1 %v624_v26 }
  0x4f   :  { %529 = vmatpush3.bf16.msra.mxu0 %v616_v18  ;;  %568 = vmatprep.subr.bf16.mxu1 %v710_v0 }
  0x50   :  { %530 = vmatprep.subr.bf16.mxu0 %v617_v19 }
  0x52   :  { %569 = vmatpush3.bf16.msra.mxu1 %v625_v27 }
  0x53   :  { %531 = vmatpush3.bf16.msra.mxu0 %v618_v21  ;;  %570 = vmatprep.subr.bf16.mxu1 %v710_v0 }
  0x54   :  { %576 = vmatprep.subr.bf16.mxu0 %v710_v0 }
  0x56   :  { %240 = vmatmul.mubr.bf16.vlgmr.msra.gmra.mrb[0].mxu0 %v70_v24  ;;  %571 = vmatpush3.bf16.msra.mxu1 %v626_v28 }
  0x57   :  { %592 = vmatprep.mubr.msk.bf16.mxu0 %vm711_vm0, %v710_v0  ;;  %577 = vmatpush3.bf16.msra.mxu0 %v627_v29 }
  0x58   :  { %578 = vmatprep.subr.bf16.mxu0 %v710_v0 }
  0x5b   :  { %579 = vmatpush3.bf16.msra.mxu0 %v628_v30 }
  0x5c   :  { %580 = vmatprep.subr.bf16.mxu0 %v710_v0 }
  0x5f   :  { %581 = vmatpush3.bf16.msra.mxu0 %v629_v31 }
  0x60   :  { %582 = vmatprep.subr.bf16.mxu0 %v710_v0 }
  0x63   :  { %583 = vmatpush3.bf16.msra.mxu0 %v630_v32 }
  0x64   :  { %584 = vmatprep.subr.bf16.mxu0 %v710_v0 }
  0x67   :  { %585 = vmatpush3.bf16.msra.mxu0 %v631_v33 }
  0x68   :  { %586 = vmatprep.subr.bf16.mxu0 %v710_v0 }
  0x6b   :  { %587 = vmatpush3.bf16.msra.mxu0 %v632_v34 }
  0x6c   :  { %588 = vmatprep.subr.bf16.mxu0 %v710_v0 }
  0x6f   :  { %589 = vmatpush3.bf16.msra.mxu0 %v633_v44 }
  0x70   :  { %590 = vmatprep.subr.bf16.mxu0 %v710_v0 }
  0x73   :  { %591 = vmatpush3.bf16.msra.mxu0 %v634_v45 }
 0x129   :  { %v532_v35 = vpop.f32.mrb[0].mxu0 }
 0x12a   :  { %v533_v37 = vpop.f32.mrb[1].mxu0 }
 0x12b   :  { %v534_v38 = vadd.f32 %v533_v37, %v532_v35  ;;  %v535_v39 = vpop.f32.mrb[2].mxu0 }
 0x12c   :  { %v536_v40 = vpop.f32.mrb[3].mxu0 }
 0x12d   :  { %v242_v41 = vadd.f32 %v534_v38, %v481_v36 }
 0x12f   :  { %v247_v42 = vmax.f32 %v242_v41, 0.0 }
 0x131   :  { %v248_v43 = vpack.c.bf16 %v247_v42, %v247_v42 }
 0x133   :  { %573 = vmatmul.mubr.bf16.vlgmr.msra.gmra.mrb[0].mxu1 %v248_v43 }
 0x206   :  { %v354_v47 = vpop.f32.mrb[0].mxu1 }
 0x207   :  { %v355_v48 = vadd.f32 %v498_v46, %v354_v47  ;;  %v574_v49 = vpop.f32.mrb[1].mxu1 }
 0x208   :  { %v357_v50 = vpop.f32.mrb[2].mxu1 }
 0x209   :  { %v360_v51 = vmax.f32 %v355_v48, 0.0  ;;  %v575_v52 = vpop.f32.mrb[3].mxu1 }
 0x20b   :  { %v361_v53 = vpack.c.bf16 %v360_v51, %v360_v51 }
 0x20d   :  { %593 = vmatmul.mubr.bf16.vlgmr.msra.gmra.mrb[4].mxu0 %v361_v53 }
 0x2e0   :  { %v467_v55 = vpop.f32.mrb[4].mxu0 }
 0x2e1   :  { %v468_v56 = vadd.f32 %v507_v54, %v467_v55  ;;  %v594_v57 = vpop.f32.mrb[5].mxu0 }
 0x2e2   :  { %v470_v58 = vpop.f32.mrb[6].mxu0 }
 0x2e3   :  { %v473_v59 = vpack.c.bf16 %v468_v56, %v468_v56  ;;  %v595_v60 = vpop.f32.mrb[7].mxu0 }
 0x2e5   :  { %474 = vst [vmem:[%s847_s7] sm:$0xf] %v473_v59 }
 0x2e6   :  { %479 = vsyncpa [#allocation3], 1 }
 0x2e7   :  { %480 = vsyncpa [#allocation5], 1 }

</bundles_post_ra>
